<compile_context>
chip_gen: v7x
topology: tpu7x:2x2x1
jax: 0.10.0
libtpu: 0.0.40
codegen_flags: <defaults>
</compile_context>

<pallas_src>
import jax
import jax.numpy as jnp
from jax.experimental import pallas as pl
from jax.experimental.pallas import tpu as pltpu


# ----------------------------- weight slab packing (done ONCE) -------------------------

def _ceil_to(v, m):
    return (v + m - 1) // m * m


def pack_slab(pieces):
    """Pack 2-D f32 arrays into one (R,128) slab; row offsets 8-aligned, lanes zero-padded."""
    offs, row0, padded = {}, 0, []
    for name, a in pieces:
        a = jnp.asarray(a, jnp.float32)
        r, c = a.shape
        assert c <= 128, f"segment {name!r} is {c} cols wide (>128); split it into lane blocks"
        rpad = _ceil_to(r, 8)
        offs[name] = (row0, r, c)
        padded.append(jnp.pad(a, ((0, rpad - r), (0, 128 - c))))
        row0 += rpad
    return jnp.concatenate(padded, axis=0), offs


def pack_weights(params):
    """Build the static weight slab once; reused across every forward call."""
    h = params["Wout"].shape[0]
    Wout_pad = jnp.zeros((h, 128), jnp.float32).at[:, :1].set(params["Wout"])
    bout_pad = jnp.zeros((1, 128), jnp.float32).at[:, :1].set(params["bout"])
    pieces = [
        ("Wg1", params["Wg1"]), ("bg1", params["bg1"]),
        ("Wg2", params["Wg2"]), ("bg2", params["bg2"]),
        ("Wh1", params["Wh1"]), ("bh1", params["bh1"]),
        ("Wh2", params["Wh2"]), ("bh2", params["bh2"]),
        ("Wfc1", params["Wfc1"]), ("Wfc2", params["Wfc2"]), ("bfc", params["bfc"]),
        ("Wout", Wout_pad), ("bout", bout_pad),
    ]
    return pack_slab(pieces)


# ----------------------------- Pallas kernel ------------------------------------------

def make_composite_kernel(offs, use_bf16=False):
    def seg(ref, name):
        r0, r, c = offs[name]
        return ref[r0:r0 + r, :c]          # static, sublane-aligned slice of the weight slab

    cast = (lambda v: v.astype(jnp.bfloat16)) if use_bf16 else (lambda v: v)

    def kernel(a_ref, p_ref, x_ref, wnode_ref, w_ref, o_ref):
        mm = lambda a, b: jnp.dot(a, b, preferred_element_type=jnp.float32)

        Wg1, bg1 = seg(w_ref, "Wg1"), seg(w_ref, "bg1")
        Wg2, bg2 = seg(w_ref, "Wg2"), seg(w_ref, "bg2")
        Wh1, bh1 = seg(w_ref, "Wh1"), seg(w_ref, "bh1")
        Wh2, bh2 = seg(w_ref, "Wh2"), seg(w_ref, "bh2")
        Wfc1, Wfc2, bfc = seg(w_ref, "Wfc1"), seg(w_ref, "Wfc2"), seg(w_ref, "bfc")
        Wout, bout = seg(w_ref, "Wout"), seg(w_ref, "bout")

        A = cast(a_ref[...])               # (n, n)
        P = cast(p_ref[...])               # (n, n)
        x = x_ref[...]                     # (n, c)
        x2 = x * wnode_ref[...]            # (n, c) * (n, 1) lane-broadcast on the VPU

        # --- GCN branch:  relu(A @ (x @ W) + b), twice ---
        g = jnp.maximum(mm(A, cast(mm(x, Wg1))) + bg1, 0.0)
        # dropout = identity (eval mode)
        g = jnp.maximum(mm(A, cast(mm(g, Wg2))) + bg2, 0.0)

        # --- Hypergraph branch (independent chain -> MXU pushes overlap with GCN chain) ---
        t = jnp.maximum(mm(P, cast(mm(x2, Wh1))) + bh1, 0.0)
        t = jnp.maximum(mm(P, cast(mm(t, Wh2))) + bh2, 0.0)

        # --- FC head: relu(concat([g, t]) @ Wfc + bfc), expressed as two matmuls ---
        f = jnp.maximum(mm(g, Wfc1) + mm(t, Wfc2) + bfc, 0.0)

        # --- output Linear(h -> 1), zero-padded to 128 lanes so the store is unmasked ---
        o_ref[...] = mm(f, Wout) + bout

    return kernel


def build_forward(n, offs, use_bf16=False):
    kernel = make_composite_kernel(offs, use_bf16)

    @jax.jit
    def forward(A_hat, P_hyp, x, w_node, wslab):
        out_wide = pl.pallas_call(
            kernel,
            out_shape=jax.ShapeDtypeStruct((n, 128), jnp.float32),
            in_specs=[pl.BlockSpec(memory_space=pltpu.MemorySpace.VMEM)] * 5,
            out_specs=pl.BlockSpec(memory_space=pltpu.MemorySpace.VMEM),
            compiler_params=pltpu.CompilerParams(vmem_limit_bytes=32 * 1024 * 1024),
        )(A_hat, P_hyp, x, w_node, wslab)
        return out_wide[:, :1]             # (n, 1)

    return forward


# ----------------------------- JAX glue: graph -> dense --------------------------------

def build_gcn_adjacency(edge_index, edge_weight, n):
    """PyG GCNConv normalization: add self loops (w=1), sym-normalize by degree."""
    src, tgt = edge_index[0], edge_index[1]
    loop = jnp.arange(n)
    src = jnp.concatenate([src, loop])
    tgt = jnp.concatenate([tgt, loop])
    w = jnp.concatenate([edge_weight, jnp.ones((n,), jnp.float32)])
    A = jnp.zeros((n, n), jnp.float32).at[tgt, src].add(w)   # A[target, source]
    deg = A.sum(axis=1)
    dinv = jnp.where(deg > 0, jax.lax.rsqrt(deg), 0.0)
    return dinv[:, None] * A * dinv[None, :]


def build_hypergraph(hyperedge_index, n, m):
    """Incidence H (N,M); propagation P = D^-1 H B^-1 H^T (hyperedge weights = 1)."""
    node, he = hyperedge_index[0], hyperedge_index[1]
    H = jnp.zeros((n, m), jnp.float32).at[node, he].add(1.0)
    D = H.sum(axis=1)       # node degree
    B = H.sum(axis=0)       # hyperedge degree
    Dinv = jnp.where(D > 0, 1.0 / D, 0.0)
    Binv = jnp.where(B > 0, 1.0 / B, 0.0)
    P = Dinv[:, None] * ((H * Binv[None, :]) @ H.T)
    return H, P


def init_linear(key, fan_in, fan_out):
    kw, kb = jax.random.split(key)
    bound = 1.0 / jnp.sqrt(jnp.float32(fan_in))
    W = jax.random.uniform(kw, (fan_in, fan_out), jnp.float32, -bound, bound)
    b = jax.random.uniform(kb, (1, fan_out), jnp.float32, -bound, bound)
    return W, b


def init_params(key, in_channels, hidden):
    ks = jax.random.split(key, 6)
    Wg1, bg1 = init_linear(ks[0], in_channels, hidden)
    Wg2, bg2 = init_linear(ks[1], hidden, hidden)
    Wh1, bh1 = init_linear(ks[2], in_channels, hidden)
    Wh2, bh2 = init_linear(ks[3], hidden, hidden)
    Wfc, bfc = init_linear(ks[4], 2 * hidden, hidden)
    Wout, bout = init_linear(ks[5], hidden, 1)
    return dict(Wg1=Wg1, bg1=bg1, Wg2=Wg2, bg2=bg2,
                Wh1=Wh1, bh1=bh1, Wh2=Wh2, bh2=bh2,
                Wfc1=Wfc[:hidden], Wfc2=Wfc[hidden:], bfc=bfc,
                Wout=Wout, bout=bout)


def reference_forward(A_hat, P_hyp, x, w_node, p):
    relu = lambda v: jnp.maximum(v, 0.0)
    h1 = relu(A_hat @ (x @ p["Wg1"]) + p["bg1"])
    h1 = relu(A_hat @ (h1 @ p["Wg2"]) + p["bg2"])
    x2 = x * w_node
    h2 = relu(P_hyp @ (x2 @ p["Wh1"]) + p["bh1"])
    h2 = relu(P_hyp @ (h2 @ p["Wh2"]) + p["bh2"])
    f = relu(h1 @ p["Wfc1"] + h2 @ p["Wfc2"] + p["bfc"])
    return f @ p["Wout"] + p["bout"]


# ----------------------------- driver ---------------------------------------------------

if __name__ == "__main__":
    N, C, HID = 16, 8, 32          # nodes, in_channels, hidden_dim
    E, M, K = 24, 6, 20            # directed edges, hyperedges, incidences

    key = jax.random.PRNGKey(0)
    k_x, k_e, k_w, k_hn, k_he, k_d, k_p = jax.random.split(key, 7)

    x = jax.random.normal(k_x, (N, C), jnp.float32)
    edge_index = jax.random.randint(k_e, (2, E), 0, N, jnp.int32)
    edge_weights = jax.random.uniform(k_w, (E,), jnp.float32, 0.1, 1.0)
    hyperedge_index = jnp.stack([
        jax.random.randint(k_hn, (K,), 0, N, jnp.int32),
        jax.random.randint(k_he, (K,), 0, M, jnp.int32)])
    hyperedge_distances = jax.random.uniform(k_d, (M,), jnp.float32, 0.1, 2.0)

    # plain-JAX glue: densify graph structure, per-node hyperedge distance sums
    A_hat = build_gcn_adjacency(edge_index, edge_weights, N)
    H_inc, P_hyp = build_hypergraph(hyperedge_index, N, M)
    # node_hyperedge_weights[n] = sum over incidences (n,e) of distances[e]  (row-broadcast)
    w_node = (H_inc @ hyperedge_distances).reshape(N, 1)

    params = init_params(k_p, C, HID)

    # weight slab built ONCE, reused across calls
    wslab, offs = pack_weights(params)
    forward = build_forward(N, offs, use_bf16=False)   # use_bf16=True on v6e/v7x for large n

    out = forward(A_hat, P_hyp, x, w_node, wslab)
    out = jax.block_until_ready(out)

    ref = reference_forward(A_hat, P_hyp, x, w_node, params)
    assert out.shape == (N, 1)
    assert jnp.allclose(out, ref, atol=1e-4, rtol=1e-4), "kernel/ref mismatch"

    print("KERNEL_OK")
</pallas_src>

<mosaic_0001>
module attributes {stable_mosaic.version = 11 : i64} {
  func.func @kernel(%arg0: memref<16x16xf32, #tpu.memory_space<vmem>>, %arg1: memref<16x16xf32, #tpu.memory_space<vmem>>, %arg2: memref<16x8xf32, #tpu.memory_space<vmem>>, %arg3: memref<16x1xf32, #tpu.memory_space<vmem>>, %arg4: memref<224x128xf32, #tpu.memory_space<vmem>>, %arg5: memref<16x128xf32, #tpu.memory_space<vmem>>) attributes {dimension_semantics = [], scalar_prefetch = 0 : i64, scratch_operands = 0 : i64, tpu.core_type = #tpu.core_type<tc>} {
    %c0 = arith.constant 0 : index
    %c0_0 = arith.constant 0 : index
    %0 = vector.load %arg4[%c0, %c0_0] : memref<224x128xf32, #tpu.memory_space<vmem>>, vector<8x32xf32>
    %c8 = arith.constant 8 : index
    %c0_1 = arith.constant 0 : index
    %1 = vector.load %arg4[%c8, %c0_1] : memref<224x128xf32, #tpu.memory_space<vmem>>, vector<1x32xf32>
    %c16 = arith.constant 16 : index
    %c0_2 = arith.constant 0 : index
    %2 = vector.load %arg4[%c16, %c0_2] : memref<224x128xf32, #tpu.memory_space<vmem>>, vector<32x32xf32>
    %c48 = arith.constant 48 : index
    %c0_3 = arith.constant 0 : index
    %3 = vector.load %arg4[%c48, %c0_3] : memref<224x128xf32, #tpu.memory_space<vmem>>, vector<1x32xf32>
    %c56 = arith.constant 56 : index
    %c0_4 = arith.constant 0 : index
    %4 = vector.load %arg4[%c56, %c0_4] : memref<224x128xf32, #tpu.memory_space<vmem>>, vector<8x32xf32>
    %c64 = arith.constant 64 : index
    %c0_5 = arith.constant 0 : index
    %5 = vector.load %arg4[%c64, %c0_5] : memref<224x128xf32, #tpu.memory_space<vmem>>, vector<1x32xf32>
    %c72 = arith.constant 72 : index
    %c0_6 = arith.constant 0 : index
    %6 = vector.load %arg4[%c72, %c0_6] : memref<224x128xf32, #tpu.memory_space<vmem>>, vector<32x32xf32>
    %c104 = arith.constant 104 : index
    %c0_7 = arith.constant 0 : index
    %7 = vector.load %arg4[%c104, %c0_7] : memref<224x128xf32, #tpu.memory_space<vmem>>, vector<1x32xf32>
    %c112 = arith.constant 112 : index
    %c0_8 = arith.constant 0 : index
    %8 = vector.load %arg4[%c112, %c0_8] : memref<224x128xf32, #tpu.memory_space<vmem>>, vector<32x32xf32>
    %c144 = arith.constant 144 : index
    %c0_9 = arith.constant 0 : index
    %9 = vector.load %arg4[%c144, %c0_9] : memref<224x128xf32, #tpu.memory_space<vmem>>, vector<32x32xf32>
    %c176 = arith.constant 176 : index
    %c0_10 = arith.constant 0 : index
    %10 = vector.load %arg4[%c176, %c0_10] : memref<224x128xf32, #tpu.memory_space<vmem>>, vector<1x32xf32>
    %c184 = arith.constant 184 : index
    %c0_11 = arith.constant 0 : index
    %11 = vector.load %arg4[%c184, %c0_11] : memref<224x128xf32, #tpu.memory_space<vmem>>, vector<32x128xf32>
    %c216 = arith.constant 216 : index
    %c0_12 = arith.constant 0 : index
    %12 = vector.load %arg4[%c216, %c0_12] : memref<224x128xf32, #tpu.memory_space<vmem>>, vector<1x128xf32>
    %c0_13 = arith.constant 0 : index
    %c0_14 = arith.constant 0 : index
    %13 = vector.load %arg0[%c0_13, %c0_14] : memref<16x16xf32, #tpu.memory_space<vmem>>, vector<16x16xf32>
    %c0_15 = arith.constant 0 : index
    %c0_16 = arith.constant 0 : index
    %14 = vector.load %arg1[%c0_15, %c0_16] : memref<16x16xf32, #tpu.memory_space<vmem>>, vector<16x16xf32>
    %c0_17 = arith.constant 0 : index
    %c0_18 = arith.constant 0 : index
    %15 = vector.load %arg2[%c0_17, %c0_18] : memref<16x8xf32, #tpu.memory_space<vmem>>, vector<16x8xf32>
    %c0_19 = arith.constant 0 : index
    %c0_20 = arith.constant 0 : index
    %16 = vector.load %arg3[%c0_19, %c0_20] : memref<16x1xf32, #tpu.memory_space<vmem>>, vector<16x1xf32>
    %17 = vector.broadcast %16 : vector<16x1xf32> to vector<16x8xf32>
    %18 = arith.mulf %15, %17 : vector<16x8xf32>
    %cst = arith.constant dense<0.000000e+00> : vector<16x32xf32>
    %19 = tpu.matmul %15, %0, %cst {dimension_numbers = #tpu.dot_dimension_numbers<[1], [0], [0], [1], [0, 0, 1, 1], [], []>} : vector<16x8xf32>, vector<8x32xf32>, vector<16x32xf32> -> vector<16x32xf32>
    %cst_21 = arith.constant dense<0.000000e+00> : vector<16x32xf32>
    %20 = tpu.matmul %13, %19, %cst_21 {dimension_numbers = #tpu.dot_dimension_numbers<[1], [0], [0], [1], [0, 0, 1, 1], [], []>} : vector<16x16xf32>, vector<16x32xf32>, vector<16x32xf32> -> vector<16x32xf32>
    %21 = vector.broadcast %1 : vector<1x32xf32> to vector<16x32xf32>
    %22 = arith.addf %20, %21 : vector<16x32xf32>
    %cst_22 = arith.constant 0.000000e+00 : f32
    %23 = vector.broadcast %cst_22 : f32 to vector<16x32xf32>
    %24 = arith.maximumf %22, %23 : vector<16x32xf32>
    %cst_23 = arith.constant dense<0.000000e+00> : vector<16x32xf32>
    %25 = tpu.matmul %24, %2, %cst_23 {dimension_numbers = #tpu.dot_dimension_numbers<[1], [0], [0], [1], [0, 0, 1, 1], [], []>} : vector<16x32xf32>, vector<32x32xf32>, vector<16x32xf32> -> vector<16x32xf32>
    %cst_24 = arith.constant dense<0.000000e+00> : vector<16x32xf32>
    %26 = tpu.matmul %13, %25, %cst_24 {dimension_numbers = #tpu.dot_dimension_numbers<[1], [0], [0], [1], [0, 0, 1, 1], [], []>} : vector<16x16xf32>, vector<16x32xf32>, vector<16x32xf32> -> vector<16x32xf32>
    %27 = vector.broadcast %3 : vector<1x32xf32> to vector<16x32xf32>
    %28 = arith.addf %26, %27 : vector<16x32xf32>
    %cst_25 = arith.constant 0.000000e+00 : f32
    %29 = vector.broadcast %cst_25 : f32 to vector<16x32xf32>
    %30 = arith.maximumf %28, %29 : vector<16x32xf32>
    %cst_26 = arith.constant dense<0.000000e+00> : vector<16x32xf32>
    %31 = tpu.matmul %18, %4, %cst_26 {dimension_numbers = #tpu.dot_dimension_numbers<[1], [0], [0], [1], [0, 0, 1, 1], [], []>} : vector<16x8xf32>, vector<8x32xf32>, vector<16x32xf32> -> vector<16x32xf32>
    %cst_27 = arith.constant dense<0.000000e+00> : vector<16x32xf32>
    %32 = tpu.matmul %14, %31, %cst_27 {dimension_numbers = #tpu.dot_dimension_numbers<[1], [0], [0], [1], [0, 0, 1, 1], [], []>} : vector<16x16xf32>, vector<16x32xf32>, vector<16x32xf32> -> vector<16x32xf32>
    %33 = vector.broadcast %5 : vector<1x32xf32> to vector<16x32xf32>
    %34 = arith.addf %32, %33 : vector<16x32xf32>
    %cst_28 = arith.constant 0.000000e+00 : f32
    %35 = vector.broadcast %cst_28 : f32 to vector<16x32xf32>
    %36 = arith.maximumf %34, %35 : vector<16x32xf32>
    %cst_29 = arith.constant dense<0.000000e+00> : vector<16x32xf32>
    %37 = tpu.matmul %36, %6, %cst_29 {dimension_numbers = #tpu.dot_dimension_numbers<[1], [0], [0], [1], [0, 0, 1, 1], [], []>} : vector<16x32xf32>, vector<32x32xf32>, vector<16x32xf32> -> vector<16x32xf32>
    %cst_30 = arith.constant dense<0.000000e+00> : vector<16x32xf32>
    %38 = tpu.matmul %14, %37, %cst_30 {dimension_numbers = #tpu.dot_dimension_numbers<[1], [0], [0], [1], [0, 0, 1, 1], [], []>} : vector<16x16xf32>, vector<16x32xf32>, vector<16x32xf32> -> vector<16x32xf32>
    %39 = vector.broadcast %7 : vector<1x32xf32> to vector<16x32xf32>
    %40 = arith.addf %38, %39 : vector<16x32xf32>
    %cst_31 = arith.constant 0.000000e+00 : f32
    %41 = vector.broadcast %cst_31 : f32 to vector<16x32xf32>
    %42 = arith.maximumf %40, %41 : vector<16x32xf32>
    %cst_32 = arith.constant dense<0.000000e+00> : vector<16x32xf32>
    %43 = tpu.matmul %30, %8, %cst_32 {dimension_numbers = #tpu.dot_dimension_numbers<[1], [0], [0], [1], [0, 0, 1, 1], [], []>} : vector<16x32xf32>, vector<32x32xf32>, vector<16x32xf32> -> vector<16x32xf32>
    %cst_33 = arith.constant dense<0.000000e+00> : vector<16x32xf32>
    %44 = tpu.matmul %42, %9, %cst_33 {dimension_numbers = #tpu.dot_dimension_numbers<[1], [0], [0], [1], [0, 0, 1, 1], [], []>} : vector<16x32xf32>, vector<32x32xf32>, vector<16x32xf32> -> vector<16x32xf32>
    %45 = arith.addf %43, %44 : vector<16x32xf32>
    %46 = vector.broadcast %10 : vector<1x32xf32> to vector<16x32xf32>
    %47 = arith.addf %45, %46 : vector<16x32xf32>
    %cst_34 = arith.constant 0.000000e+00 : f32
    %48 = vector.broadcast %cst_34 : f32 to vector<16x32xf32>
    %49 = arith.maximumf %47, %48 : vector<16x32xf32>
    %cst_35 = arith.constant dense<0.000000e+00> : vector<16x128xf32>
    %50 = tpu.matmul %49, %11, %cst_35 {dimension_numbers = #tpu.dot_dimension_numbers<[1], [0], [0], [1], [0, 0, 1, 1], [], []>} : vector<16x32xf32>, vector<32x128xf32>, vector<16x128xf32> -> vector<16x128xf32>
    %51 = vector.broadcast %12 : vector<1x128xf32> to vector<16x128xf32>
    %52 = arith.addf %50, %51 : vector<16x128xf32>
    %c0_36 = arith.constant 0 : index
    %c0_37 = arith.constant 0 : index
    %53 = vector.load %arg5[%c0_36, %c0_37] : memref<16x128xf32, #tpu.memory_space<vmem>>, vector<16x128xf32>
    tpu.vector_store %arg5[%c0_36, %c0_37], %52 {strides = array<i32>} : memref<16x128xf32, #tpu.memory_space<vmem>>, vector<16x128xf32>,
    return
  }
}

</mosaic_0001>

<bundles_post_ra>
// kernel: forward.1
= control target key start
LH: loop header
LB: loop body
LE: loop exit
PB: predicated region body
PF: predicated region fallthrough
CT: control target
= control target key end

     0   :  { %10 = vsyncpa [#allocation3], 0  ;;  %s1267_s18 = smov [#allocation2]   ;;  %s1368_s0 = inlined_call_operand.vmem [shape: f32[16,16], index: 0, kind: input, shape index: {}]   ;;  %s1369_s1 = inlined_call_operand.vmem [shape: f32[16,16], index: 1, kind: input, shape index: {}]   ;;  %s1370_s2 = inlined_call_operand.vmem [shape: f32[16,8], index: 2, kind: input, shape index: {}]   ;;  %s1371_s3 = inlined_call_operand.vmem [shape: f32[16,1], index: 3, kind: input, shape index: {}]   ;;  %s1372_s4 = inlined_call_operand.hbm [shape: f32[224,128], index: 4, kind: input, shape index: {}]   ;;  %s1373_s5 = inlined_call_operand.vmem [shape: f32[16,128], index: 5, kind: output, shape index: {}]  }
   0x1   :  { %s24_s19 = sshll.u32 %s1267_s18, 4  ;;  %s1243_s22 = scalar_lea.hbm %s1372_s4, 3584  ;;  %s25_s19 = int_to_ptr.vmem [resolvable:$true] %s24_s19 }
   0x2   :  { %p1244_p0 = scmp.ne.s32.totalorder %s1372_s4, %s1243_s22  ;;  %p1247_p1 = scmp.lt.u32.totalorder %s1243_s22, %s1372_s4 }
   0x4   :  { %p1249_p2 = pnand %p1247_p1, %p1244_p0 }
   0x6   :  { %1252 = shalt.err (!%p1249_p2)
}
   0x7   :  { %s1253_s27 = scalar_lea.vmem %s25_s19, 3584  ;;  %p1258_p4 = scmp.lt.s32.totalorder %s25_s19, %s25_s19 }
   0x8   :  { %p1254_p3 = scmp.ne.s32.totalorder %s25_s19, %s1253_s27  ;;  %p1259_p5 = scmp.lt.s32.totalorder %s1253_s27, %s1253_s27 }
   0xa   :  { %p1260_p6 = por %p1259_p5, %p1258_p4 }
   0xc   :  { %p1261_p7 = pnand %p1260_p6, %p1254_p3 }
   0xe   :  { %1264 = shalt.err (!%p1261_p7)
}
   0xf   :  { %s1268_s28 = smov 128   ;;  %s1269_s29 = smov 8  }
  0x10   :  { %30 = dma.hbm_to_vmem [thread:$0]  %s1372_s4, 3584, %s25_s19, [#allocation3], %s1268_s28, %s1268_s28, %s1269_s29  }
  0x11   :  { %1265 = dma.done.wait [#allocation3], 3584  }
  0x12   :  { %1266 = vsyncadd [#allocation3], 4294963712  ;;  %vm82_vm0 = vcmask 64512   ;;  %v34_v0 = vld [vmem:[#allocation2] sm:$0xff]  ;;  %v67_v2 = vld [vmem:[%s1370_s2 + $0x8] sm:$0xff]  ;;  %vm168_vm1 = vcmask 130048  }
  0x13   :  { %v66_v1 = vld [vmem:[%s1370_s2] sm:$0xff]  ;;  %1087 = vmatprep.subr.mxu1 %v34_v0  ;;  %v36_v4 = vld [vmem:[#allocation2 + $0x10] sm:$0xff]  ;;  %v37_v5 = vld [vmem:[#allocation2 + $0x18] sm:$0xff]  ;;  %v1270_v15 = vmov 0   ;;  %vm252_vm2 = vcmask 261120  }
  0x14   :  { %1089 = vmatprep.mubr.msk.f32.mxu1 %vm82_vm0, %v66_v1  ;;  %1088 = vmatpush3.msra.mxu1 %v34_v0  ;;  %v62_v3 = vld [vmem:[%s1368_s0] sm:$0xff]  ;;  %v1184_v6 = vpack.c.bf16 %v37_v5, %v36_v4  ;;  %v63_v10 = vld [vmem:[%s1368_s0 + $0x8] sm:$0xff]  ;;  %v41_v28 = vld [vmem:[#allocation2 + $0x38] sm:$0xff] }
  0x15   :  { %1090 = vmatmul.mubr.msk.f32.vlgmr.msra.gmra.mrb[0].mxu1 %vm82_vm0, %v67_v2  ;;  %v38_v11 = vld [vmem:[#allocation2 + $0x20] sm:$0xff]  ;;  %v39_v12 = vld [vmem:[#allocation2 + $0x28] sm:$0xff]  ;;  %1242 = vset.pattern.permute.xlu0 %v1270_v15  ;;  %v44_v34 = vld [vmem:[#allocation2 + $0x50] sm:$0xff] }
  0x16   :  { %1096 = vmatprep.mubr.msk.f32.mxu1 %vm168_vm1, %v62_v3  ;;  %1185 = vmatprep.subr.bf16.mxu0 %v1184_v6  ;;  %v1188_v13 = vpack.c.bf16 %v39_v12, %v38_v11  ;;  %v68_v14 = vld [vmem:[%s1371_s3] sm:$0xff]  ;;  %v69_v16 = vld [vmem:[%s1371_s3 + $0x8] sm:$0xff]  ;;  %v45_v42 = vld [vmem:[#allocation2 + $0x58] sm:$0xff] }
  0x17   :  { %1187 = vmatpush3.bf16.msra.mxu0 %v1184_v6  ;;  %72 = vperm.xlu0 %1242, %v68_v14   ;;  %v1009_v17 = vld [vmem:[#allocation2 + $0x8] ss:$0 sm:$0xff]  ;;  %v64_v32 = vld [vmem:[%s1369_s1] sm:$0xff]  ;;  %v52_v52 = vld [vmem:[#allocation2 + $0x90] sm:$0xff] }
  0x18   :  { %1189 = vmatprep.subr.bf16.mxu0 %v1188_v13  ;;  %v43_v33 = vld [vmem:[#allocation2 + $0x48] sm:$0xff]  ;;  %v46_v43 = vld [vmem:[#allocation2 + $0x60] sm:$0xff]  ;;  %v53_v53 = vld [vmem:[#allocation2 + $0x98] sm:$0xff] }
  0x19   :  { %v1200_v35 = vpack.c.bf16 %v44_v34, %v43_v33  ;;  %v65_v41 = vld [vmem:[%s1369_s1 + $0x8] sm:$0xff]  ;;  %v1204_v44 = vpack.c.bf16 %v46_v43, %v45_v42  ;;  %v1019_v45 = vld [vmem:[#allocation2 + $0x40] ss:$0 sm:$0xff]  ;;  %v1212_v57 = vpack.c.bf16 %v53_v53, %v52_v52  ;;  %v48_v61 = vld [vmem:[#allocation2 + $0x70] sm:$0xff] }
  0x1a   :  { %v54_v58 = vld [vmem:[#allocation2 + $0xa0] sm:$0xff]  ;;  %v55_v59 = vld [vmem:[#allocation2 + $0xa8] sm:$0xff]  ;;  %v49_v62 = vld [vmem:[#allocation2 + $0x78] sm:$0xff] }
  0x1b   :  { %1191 = vmatpush3.bf16.msra.mxu0 %v1188_v13  ;;  %77 = vperm.xlu0 %1242, %v69_v16   ;;  %v1216_v60 = vpack.c.bf16 %v55_v59, %v54_v58  ;;  %v1220_v63 = vpack.c.bf16 %v49_v62, %v48_v61  ;;  %v57_v0 = vld [vmem:[#allocation2 + $0xb8] sm:$0xff]  ;;  %v1014_v4 = vld [vmem:[#allocation2 + $0x30] ss:$0 sm:$0xff]  ;;  %v51_v11 = vld [vmem:[#allocation2 + $0x88] sm:$0xff] }
  0x96   :  { %v73_v25 = vpop.permute.xlu0 %72 }
  0x97   :  { %v80_v29 = vmul.f32 %v73_v25, %v66_v1  ;;  %v58_v1 = vld [vmem:[#allocation2 + $0xc0] sm:$0xff] }
  0x9a   :  { %v78_v30 = vpop.permute.xlu0 %77 }
  0x9b   :  { %v81_v31 = vmul.f32 %v78_v30, %v67_v2  ;;  %v1228_v2 = vpack.c.bf16 %v58_v1, %v57_v0 }
  0xe8   :  { %v1091_v7 = vpop.f32.mrb[0].mxu1 }
  0xe9   :  { %v155_v8 = vpop.f32.mrb[1].mxu1 }
  0xea   :  { %v1180_v9 = vpack.c.bf16 %v1091_v7, %v155_v8 }
  0xec   :  { %1181 = vmatprep.subr.bf16.mxu1 %v1180_v9 }
  0xed   :  { %1183 = vmatpush3.bf16.msra.mxu1 %v1180_v9 }
  0xf0   :  { %1097 = vmatmul.mubr.msk.f32.vlgmr.msra.gmra.mrb[2].mxu1 %vm168_vm1, %v63_v10 }
  0xf1   :  { %1114 = vmatprep.mubr.msk.f32.mxu1 %vm168_vm1, %v62_v3  ;;  %v1024_v3 = vld [vmem:[#allocation2 + $0x68] ss:$0 sm:$0xff] }
 0x1c3   :  { %v1098_v18 = vpop.f32.mrb[2].mxu1 }
 0x1c4   :  { %v247_v19 = vadd.f32 %v1098_v18, %v1009_v17  ;;  %v241_v20 = vpop.f32.mrb[3].mxu1  ;;  %v59_v18 = vld [vmem:[#allocation2 + $0xc8] sm:$0xff] }
 0x1c5   :  { %v242_v21 = vadd.f32 %v1009_v17, %v241_v20 }
 0x1c6   :  { %v251_v23 = vmax.f32 %v247_v19, 0.0  ;;  %v60_v19 = vld [vmem:[#allocation2 + $0xd0] sm:$0xff] }
 0x1c7   :  { %v250_v22 = vmax.f32 %v242_v21, 0.0  ;;  %v1232_v20 = vpack.c.bf16 %v60_v19, %v59_v18  ;;  %v1031_v21 = vld [vmem:[#allocation2 + $0xb0] ss:$0 sm:$0xff] }
 0x1c9   :  { %1107 = vmatprep.mubr.msk.f32.mxu0 %vm252_vm2, %v250_v22 }
 0x1ca   :  { %1108 = vmatmul.mubr.msk.f32.vlgmr.msra.gmra.mrb[0].mxu0 %vm252_vm2, %v251_v23 }
 0x1cb   :  { %1126 = vmatprep.mubr.msk.f32.mxu0 %vm168_vm1, %v64_v32 }
 0x29d   :  { %v1109_v24 = vpop.f32.mrb[0].mxu0 }
 0x29e   :  { %v325_v26 = vpop.f32.mrb[1].mxu0 }
 0x29f   :  { %v1192_v27 = vpack.c.bf16 %v1109_v24, %v325_v26 }
 0x2a1   :  { %1193 = vmatprep.subr.bf16.mxu1 %v1192_v27 }
 0x2a2   :  { %1195 = vmatpush3.bf16.msra.mxu1 %v1192_v27 }
 0x2a3   :  { %1117 = vmatprep.subr.mxu1 %v41_v28 }
 0x2a5   :  { %1115 = vmatmul.mubr.msk.f32.vlgmr.msra.gmra.mrb[4].mxu1 %vm168_vm1, %v63_v10  ;;  %v50_v10 = vld [vmem:[#allocation2 + $0x80] sm:$0xff] }
 0x2a6   :  { %1118 = vmatpush3.msra.mxu1 %v41_v28  ;;  %1119 = vmatprep.mubr.msk.f32.mxu1 %vm82_vm0, %v80_v29  ;;  %v1224_v14 = vpack.c.bf16 %v51_v11, %v50_v10  ;;  %v1032_v28 = vld [vmem:[#allocation2 + $0xd8] ss:$0 sm:$0xff] }
 0x2a7   :  { %1201 = vmatprep.subr.bf16.mxu1 %v1200_v35 }
 0x2a9   :  { %1120 = vmatmul.mubr.msk.f32.vlgmr.msra.gmra.mrb[6].mxu1 %vm82_vm0, %v81_v31 }
 0x2aa   :  { %1203 = vmatpush3.bf16.msra.mxu1 %v1200_v35 }
 0x2ab   :  { %1205 = vmatprep.subr.bf16.mxu1 %v1204_v44 }
 0x2ae   :  { %1207 = vmatpush3.bf16.msra.mxu1 %v1204_v44 }
 0x2af   :  { %1229 = vmatprep.subr.bf16.mxu1 %v1228_v2 }
 0x378   :  { %v1345_v36 = vpop.f32.mrb[4].mxu1 }
 0x379   :  { %v404_v37 = vpop.f32.mrb[5].mxu1  ;;  %v410_v16 = vadd.f32 %v1345_v36, %v1014_v4 }
 0x37a   :  { %v405_v8 = vadd.f32 %v1014_v4, %v404_v37 }
 0x37b   :  { %v414_v17 = vmax.f32 %v410_v16, 0.0 }
 0x37c   :  { %v1121_v38 = vpop.f32.mrb[6].mxu1  ;;  %v413_v15 = vmax.f32 %v405_v8, 0.0 }
 0x37d   :  { %v487_v39 = vpop.f32.mrb[7].mxu1 }
 0x37e   :  { %v1196_v40 = vpack.c.bf16 %v1121_v38, %v487_v39 }
 0x380   :  { %1197 = vmatprep.subr.bf16.mxu0 %v1196_v40 }
 0x381   :  { %1199 = vmatpush3.bf16.msra.mxu0 %v1196_v40 }
 0x384   :  { %1127 = vmatmul.mubr.msk.f32.vlgmr.msra.gmra.mrb[2].mxu0 %vm168_vm1, %v65_v41 }
 0x385   :  { %1144 = vmatprep.mubr.msk.f32.mxu0 %vm168_vm1, %v64_v32 }
 0x457   :  { %v1128_v46 = vpop.f32.mrb[2].mxu0 }
 0x458   :  { %v578_v47 = vadd.f32 %v1128_v46, %v1019_v45  ;;  %v572_v48 = vpop.f32.mrb[3].mxu0 }
 0x459   :  { %v573_v49 = vadd.f32 %v1019_v45, %v572_v48 }
 0x45a   :  { %v582_v51 = vmax.f32 %v578_v47, 0.0 }
 0x45b   :  { %v581_v50 = vmax.f32 %v573_v49, 0.0 }
 0x45d   :  { %1137 = vmatprep.mubr.msk.f32.mxu1 %vm252_vm2, %v581_v50 }
 0x45e   :  { %1138 = vmatmul.mubr.msk.f32.vlgmr.msra.gmra.mrb[8].mxu1 %vm252_vm2, %v582_v51 }
 0x45f   :  { %1231 = vmatpush3.bf16.msra.mxu1 %v1228_v2 }
 0x460   :  { %1233 = vmatprep.subr.bf16.mxu1 %v1232_v20 }
 0x463   :  { %1235 = vmatpush3.bf16.msra.mxu1 %v1232_v20 }
 0x531   :  { %v1139_v54 = vpop.f32.mrb[8].mxu1 }
 0x532   :  { %v655_v55 = vpop.f32.mrb[9].mxu1 }
 0x533   :  { %v1208_v56 = vpack.c.bf16 %v1139_v54, %v655_v55 }
 0x535   :  { %1209 = vmatprep.subr.bf16.mxu0 %v1208_v56 }
 0x536   :  { %1211 = vmatpush3.bf16.msra.mxu0 %v1208_v56 }
 0x537   :  { %1213 = vmatprep.subr.bf16.mxu0 %v1212_v57 }
 0x539   :  { %1145 = vmatmul.mubr.msk.f32.vlgmr.msra.gmra.mrb[4].mxu0 %vm168_vm1, %v65_v41 }
 0x53a   :  { %1215 = vmatpush3.bf16.msra.mxu0 %v1212_v57 }
 0x53b   :  { %1217 = vmatprep.subr.bf16.mxu0 %v1216_v60 }
 0x53e   :  { %1219 = vmatpush3.bf16.msra.mxu0 %v1216_v60 }
 0x53f   :  { %1221 = vmatprep.subr.bf16.mxu0 %v1220_v63 }
 0x60c   :  { %v1146_v5 = vpop.f32.mrb[4].mxu0 }
 0x60d   :  { %v740_v6 = vadd.f32 %v1146_v5, %v1024_v3  ;;  %v734_v7 = vpop.f32.mrb[5].mxu0 }
 0x60e   :  { %v735_v9 = vadd.f32 %v1024_v3, %v734_v7 }
 0x60f   :  { %v744_v13 = vmax.f32 %v740_v6, 0.0 }
 0x610   :  { %v743_v12 = vmax.f32 %v735_v9, 0.0 }
 0x612   :  { %1155 = vmatprep.mubr.msk.f32.mxu0 %vm252_vm2, %v743_v12 }
 0x613   :  { %1156 = vmatmul.mubr.msk.f32.vlgmr.msra.gmra.mrb[6].mxu0 %vm252_vm2, %v744_v13 }
 0x614   :  { %1223 = vmatpush3.bf16.msra.mxu0 %v1220_v63  ;;  %1166 = vmatprep.mubr.msk.f32.mxu0 %vm252_vm2, %v413_v15 }
 0x615   :  { %1225 = vmatprep.subr.bf16.mxu0 %v1224_v14 }
 0x618   :  { %1227 = vmatpush3.bf16.msra.mxu0 %v1224_v14 }
 0x61b   :  { %1167 = vmatmul.mubr.msk.f32.vlgmr.msra.gmra.mrb[6].mxu0 %vm252_vm2, %v414_v17 }
 0x6ee   :  { %v1168_v22 = vpop.f32.mrb[6].mxu0 }
 0x6ef   :  { %v912_v23 = vadd.f32 %v1168_v22, %v1031_v21  ;;  %v898_v24 = vpop.f32.mrb[7].mxu0 }
 0x6f0   :  { %v911_v25 = vadd.f32 %v1031_v21, %v898_v24 }
 0x6f1   :  { %v914_v27 = vmax.f32 %v912_v23, 0.0 }
 0x6f2   :  { %v913_v26 = vmax.f32 %v911_v25, 0.0 }
 0x6f4   :  { %1177 = vmatprep.mubr.msk.f32.mxu1 %vm252_vm2, %v913_v26 }
 0x6f5   :  { %1178 = vmatmul.mubr.msk.f32.vlgmr.msra.gmra.mrb[10].mxu1 %vm252_vm2, %v914_v27 }
 0x7c8   :  { %v1179_v29 = vpop.f32.mrb[10].mxu1 }
 0x7c9   :  { %v997_v30 = vadd.f32 %v1179_v29, %v1032_v28  ;;  %v991_v31 = vpop.f32.mrb[11].mxu1 }
 0x7ca   :  { %v992_v32 = vadd.f32 %v1032_v28, %v991_v31 }
 0x7cb   :  { %1001 = vst [vmem:[%s1373_s5 + $0x8] sm:$0xff] %v997_v30 }
 0x7cc   :  { %1000 = vst [vmem:[%s1373_s5] sm:$0xff] %v992_v32 }
 0x7cd   :  { %1006 = vsyncpa [#allocation3], 1 }

</bundles_post_ra>
